<compile_context>
chip_gen: v7x
topology: tpu7x:2x2x1
jax: 0.10.0
libtpu: 0.0.40
codegen_flags: <defaults>
</compile_context>

<pallas_src>
import functools

import numpy as np
import jax
import jax.numpy as jnp
from jax.experimental import pallas as pl
from jax.experimental.pallas import tpu as pltpu

_EPS = 1e-5  # matches the PyTorch module


def _layernorm_kernel(x_ref, sm_ref, stw_ref, b_ref, o_ref, *, inv_c):
    # x_ref  : (TR, L) packed rows in the input's native dtype, L = G*C (mult of 128)
    # sm_ref : (L, G)  0/1 segment-membership matrix (same dtype as x)
    # stw_ref: (G, L)  f32 broadcast-back matrix with `weight` folded in
    # b_ref  : (1, L)  f32 bias, lane-tiled G times
    # o_ref  : (TR, L)
    x = x_ref[...]
    sm = sm_ref[...]

    # Two INDEPENDENT per-segment reductions on the MXU (f32 accumulation):
    s1 = jnp.dot(x, sm, preferred_element_type=jnp.float32)        # sum(x)   (TR, G)
    s2 = jnp.dot(x * x, sm, preferred_element_type=jnp.float32)    # sum(x^2) (TR, G)

    m1 = s1 * jnp.float32(inv_c)                                   # E[x]
    m2 = s2 * jnp.float32(inv_c)                                   # E[x^2]
    var = m2 - m1 * m1                                             # biased variance
    inv = jax.lax.rsqrt(var + jnp.float32(_EPS))                   # EUP slot

    # Two INDEPENDENT broadcasts back to full lane width (MXU), weight folded:
    #   scale_full[r, i] = inv[r, i//C]  * w[i%C]
    #   shift_full[r, i] = -mu[r, i//C] * inv[r, i//C] * w[i%C]
    stw = stw_ref[...]
    scale_full = jnp.dot(inv, stw, preferred_element_type=jnp.float32)        # (TR, L)
    shift_full = jnp.dot(-m1 * inv, stw, preferred_element_type=jnp.float32)  # (TR, L)

    y = x.astype(jnp.float32) * scale_full + shift_full + b_ref[...]
    o_ref[...] = y.astype(o_ref.dtype)


def withbias_layernorm_pallas(x, weight, bias):
    """LayerNorm over the last dim of `x`, with weight/bias of shape (C,)."""
    C = x.shape[-1]
    assert weight.shape == (C,) and bias.shape == (C,)
    orig_shape = x.shape
    R = int(np.prod(orig_shape[:-1]))

    # Pack G consecutive rows into the lane axis so the kernel's last dim is a
    # multiple of 128 (fully dense loads/stores). Pad rows (only if needed) so the
    # packed row count is a multiple of 8; padded rows are sliced off afterwards.
    G = int(np.lcm(C, 128) // C)            # power of 2 in [1, 128]
    pad_unit = 8 * G
    R_pad = ((R + pad_unit - 1) // pad_unit) * pad_unit
    x2d = x.reshape(R, C)
    if R_pad != R:
        x2d = jnp.pad(x2d, ((0, R_pad - R), (0, 0)))
    L = G * C                               # multiple of 128
    Rp = R_pad // G                         # multiple of 8
    x2 = x2d.reshape(Rp, L)                 # free row-major reshape

    # Constant segment matrices + lane-tiled affine params (tiny, grid-invariant).
    seg = np.kron(np.eye(G, dtype=np.float32),
                  np.ones((C, 1), dtype=np.float32))                       # (L, G)
    sm = jnp.asarray(seg, dtype=x.dtype)                                    # 0/1 membership
    w_full = jnp.tile(weight.astype(jnp.float32).reshape(1, C), (1, G))     # (1, L)
    b_full = jnp.tile(bias.astype(jnp.float32).reshape(1, C), (1, G))       # (1, L)
    stw = jnp.asarray(seg.T) * w_full                                       # (G, L), weight folded

    # Fixed, VMEM-budgeted row tile (no divisor search): count double-buffered
    # in/out blocks at x.dtype plus ~4 materialized f32 (tr, L) intermediates.
    itemsize = jnp.dtype(x.dtype).itemsize
    per_row = 2 * 2 * (L * itemsize) + 4 * (L * 4)   # 2x dbuf (in + out) + f32 temps
    budget = 12 * 1024 * 1024                        # safe on v5e/v6e/v7x scoped VMEM
    tr = max(8, min(1024, (budget // per_row) // 8 * 8))
    if Rp > 16:
        # Prefer >= 2 grid blocks: enables pipelining and lets v7x's 2 TCs split rows.
        tr = min(tr, ((Rp + 1) // 2 + 7) // 8 * 8)
    tr = min(tr, Rp)
    grid = pl.cdiv(Rp, tr)   # ragged last block is fine: rows are independent and
                             # out-of-bounds rows are never stored.

    kernel = functools.partial(_layernorm_kernel, inv_c=float(1.0 / C))

    out2 = pl.pallas_call(
        kernel,
        out_shape=jax.ShapeDtypeStruct((Rp, L), x.dtype),
        grid_spec=pltpu.PrefetchScalarGridSpec(
            num_scalar_prefetch=0,
            grid=(grid,),
            in_specs=[
                pl.BlockSpec((tr, L), lambda i: (i, 0)),   # x rows (pipelined)
                pl.BlockSpec((L, G), lambda i: (0, 0)),    # segment membership (0/1)
                pl.BlockSpec((G, L), lambda i: (0, 0)),    # broadcast-back * weight
                pl.BlockSpec((1, L), lambda i: (0, 0)),    # bias (lane-tiled)
            ],
            out_specs=pl.BlockSpec((tr, L), lambda i: (i, 0)),
        ),
        compiler_params=pltpu.CompilerParams(
            dimension_semantics=(pltpu.PARALLEL,),
            vmem_limit_bytes=32 * 1024 * 1024,
        ),
    )(x2, sm, stw, b_full)

    out = out2.reshape(R_pad, C)
    if R_pad != R:
        out = out[:R]
    return out.reshape(orig_shape)


def withbias_layernorm_reference(x, weight, bias):
    # Pure-JAX mirror of the PyTorch forward.
    mu = jnp.mean(x, axis=-1, keepdims=True)
    var = jnp.mean(jnp.square(x - mu), axis=-1, keepdims=True)   # unbiased=False
    return (x - mu) / jnp.sqrt(var + _EPS) * weight + bias


if __name__ == "__main__":
    # Shapes as this module sees them inside the Transformer block:
    # to_3d(NCHW image) -> (batch, H*W tokens, C channels), normalized over C.
    B, HW, C = 2, 16 * 16, 48
    key = jax.random.PRNGKey(0)
    kx, kw, kb = jax.random.split(key, 3)
    x = jax.random.normal(kx, (B, HW, C), jnp.float32)
    # The module initializes weight=1, bias=0; use non-trivial values so the
    # affine part is actually exercised.
    weight = 1.0 + 0.1 * jax.random.normal(kw, (C,), jnp.float32)
    bias = 0.1 * jax.random.normal(kb, (C,), jnp.float32)

    out = jax.block_until_ready(withbias_layernorm_pallas(x, weight, bias))
    ref = withbias_layernorm_reference(x, weight, bias)
    assert out.shape == x.shape
    np.testing.assert_allclose(np.asarray(out), np.asarray(ref), atol=1e-4, rtol=1e-4)
    print("KERNEL_OK")
</pallas_src>

<mosaic_0001>
module attributes {stable_mosaic.version = 11 : i64} {
  func.func @_layernorm_kernel(%arg0: i32, %arg1: memref<32x384xf32, #tpu.memory_space<vmem>>, %arg2: memref<384x8xf32, #tpu.memory_space<vmem>>, %arg3: memref<8x384xf32, #tpu.memory_space<vmem>>, %arg4: memref<1x384xf32, #tpu.memory_space<vmem>>, %arg5: memref<32x384xf32, #tpu.memory_space<vmem>>) attributes {dimension_semantics = [#tpu.dimension_semantics<parallel>], iteration_bounds = array<i64: 2>, scalar_prefetch = 0 : i64, scratch_operands = 0 : i64, tpu.core_type = #tpu.core_type<tc>, window_params = [{transform_indices = @transform_0, window_bounds = array<i64: 32, 384>}, {pipeline_mode = #tpu.pipeline_mode<synchronous>, transform_indices = @transform_1, window_bounds = array<i64: 384, 8>}, {pipeline_mode = #tpu.pipeline_mode<synchronous>, transform_indices = @transform_2, window_bounds = array<i64: 8, 384>}, {pipeline_mode = #tpu.pipeline_mode<synchronous>, transform_indices = @transform_3, window_bounds = array<i64: 1, 384>}, {transform_indices = @transform_4, window_bounds = array<i64: 32, 384>}]} {
    %c0 = arith.constant 0 : index
    %c0_0 = arith.constant 0 : index
    %0 = vector.load %arg1[%c0, %c0_0] : memref<32x384xf32, #tpu.memory_space<vmem>>, vector<32x384xf32>
    %c0_1 = arith.constant 0 : index
    %c0_2 = arith.constant 0 : index
    %1 = vector.load %arg2[%c0_1, %c0_2] : memref<384x8xf32, #tpu.memory_space<vmem>>, vector<384x8xf32>
    %cst = arith.constant dense<0.000000e+00> : vector<32x8xf32>
    %2 = tpu.matmul %0, %1, %cst {dimension_numbers = #tpu.dot_dimension_numbers<[1], [0], [0], [1], [0, 0, 1, 1], [], []>} : vector<32x384xf32>, vector<384x8xf32>, vector<32x8xf32> -> vector<32x8xf32>
    %3 = arith.mulf %0, %0 : vector<32x384xf32>
    %cst_3 = arith.constant dense<0.000000e+00> : vector<32x8xf32>
    %4 = tpu.matmul %3, %1, %cst_3 {dimension_numbers = #tpu.dot_dimension_numbers<[1], [0], [0], [1], [0, 0, 1, 1], [], []>} : vector<32x384xf32>, vector<384x8xf32>, vector<32x8xf32> -> vector<32x8xf32>
    %cst_4 = arith.constant 0.020833334 : f32
    %5 = vector.broadcast %cst_4 : f32 to vector<32x8xf32>
    %6 = arith.mulf %2, %5 : vector<32x8xf32>
    %cst_5 = arith.constant 0.020833334 : f32
    %7 = vector.broadcast %cst_5 : f32 to vector<32x8xf32>
    %8 = arith.mulf %4, %7 : vector<32x8xf32>
    %9 = arith.mulf %6, %6 : vector<32x8xf32>
    %10 = arith.subf %8, %9 : vector<32x8xf32>
    %cst_6 = arith.constant 9.99999974E-6 : f32
    %11 = vector.broadcast %cst_6 : f32 to vector<32x8xf32>
    %12 = arith.addf %10, %11 : vector<32x8xf32>
    %13 = math.rsqrt %12 : vector<32x8xf32>
    %c0_7 = arith.constant 0 : index
    %c0_8 = arith.constant 0 : index
    %14 = vector.load %arg3[%c0_7, %c0_8] : memref<8x384xf32, #tpu.memory_space<vmem>>, vector<8x384xf32>
    %cst_9 = arith.constant dense<0.000000e+00> : vector<32x384xf32>
    %15 = tpu.matmul %13, %14, %cst_9 {dimension_numbers = #tpu.dot_dimension_numbers<[1], [0], [0], [1], [0, 0, 1, 1], [], []>} : vector<32x8xf32>, vector<8x384xf32>, vector<32x384xf32> -> vector<32x384xf32>
    %cst_10 = arith.constant 0.000000e+00 : f32
    %16 = vector.broadcast %cst_10 : f32 to vector<32x8xf32>
    %17 = arith.subf %16, %6 : vector<32x8xf32>
    %18 = arith.mulf %17, %13 : vector<32x8xf32>
    %cst_11 = arith.constant dense<0.000000e+00> : vector<32x384xf32>
    %19 = tpu.matmul %18, %14, %cst_11 {dimension_numbers = #tpu.dot_dimension_numbers<[1], [0], [0], [1], [0, 0, 1, 1], [], []>} : vector<32x8xf32>, vector<8x384xf32>, vector<32x384xf32> -> vector<32x384xf32>
    %20 = arith.mulf %0, %15 : vector<32x384xf32>
    %21 = arith.addf %20, %19 : vector<32x384xf32>
    %c0_12 = arith.constant 0 : index
    %c0_13 = arith.constant 0 : index
    %22 = vector.load %arg4[%c0_12, %c0_13] : memref<1x384xf32, #tpu.memory_space<vmem>>, vector<1x384xf32>
    %23 = vector.broadcast %22 : vector<1x384xf32> to vector<32x384xf32>
    %24 = arith.addf %21, %23 : vector<32x384xf32>
    %c0_14 = arith.constant 0 : index
    %c0_15 = arith.constant 0 : index
    %25 = vector.load %arg5[%c0_14, %c0_15] : memref<32x384xf32, #tpu.memory_space<vmem>>, vector<32x384xf32>
    tpu.vector_store %arg5[%c0_14, %c0_15], %24 {strides = array<i32>} : memref<32x384xf32, #tpu.memory_space<vmem>>, vector<32x384xf32>,
    return
  }
  func.func @transform_0(%arg0: i32) -> (i32, i32) {
    %c0_i32 = arith.constant 0 : i32
    %c0_i32_0 = arith.constant 0 : i32
    return %arg0, %c0_i32 : i32, i32
  }
  func.func @transform_1(%arg0: i32) -> (i32, i32) {
    %c0_i32 = arith.constant 0 : i32
    %c0_i32_0 = arith.constant 0 : i32
    %c0_i32_1 = arith.constant 0 : i32
    return %c0_i32, %c0_i32_0 : i32, i32
  }
  func.func @transform_2(%arg0: i32) -> (i32, i32) {
    %c0_i32 = arith.constant 0 : i32
    %c0_i32_0 = arith.constant 0 : i32
    %c0_i32_1 = arith.constant 0 : i32
    return %c0_i32, %c0_i32_0 : i32, i32
  }
  func.func @transform_3(%arg0: i32) -> (i32, i32) {
    %c0_i32 = arith.constant 0 : i32
    %c0_i32_0 = arith.constant 0 : i32
    %c0_i32_1 = arith.constant 0 : i32
    return %c0_i32, %c0_i32_0 : i32, i32
  }
  func.func @transform_4(%arg0: i32) -> (i32, i32) {
    %c0_i32 = arith.constant 0 : i32
    %c0_i32_0 = arith.constant 0 : i32
    return %arg0, %c0_i32 : i32, i32
  }
}

</mosaic_0001>

<bundles_post_ra>
// kernel: tpu_custom_call.1
= control target key start
LH: loop header
LB: loop body
LE: loop exit
PB: predicated region body
PF: predicated region fallthrough
CT: control target
= control target key end

     0   :  { %9 = vsyncpa [#allocation3], 0  ;;  %s2213_s0 = inlined_call_operand.vmem [shape: f32[64,384], index: 0, kind: input, shape index: {}]   ;;  %s2214_s1 = inlined_call_operand.vmem [shape: f32[384,8], index: 1, kind: input, shape index: {}]   ;;  %s2215_s2 = inlined_call_operand.vmem [shape: f32[8,384], index: 2, kind: input, shape index: {}]   ;;  %s2216_s3 = inlined_call_operand.vmem [shape: f32[1,384], index: 3, kind: input, shape index: {}]   ;;  %s2217_s4 = inlined_call_operand.hbm [shape: f32[64,384], index: 4, kind: output, shape index: {}]  }
   0x1   :  { %11 = vsyncpa [#allocation3 + $0x1], 0  ;;  %s1697_s15 = smov 0   ;;  %s1699_s16 = smov 0  }
   0x2   :  { %s1701_s17 = smov 0   ;;  %s1703_s18 = smov 0  }
   0x3 LB: > { %s1718_s19 = sadd.s32 4294967295, %s1666_s18   ;;  %s1164_s20 = sadd.s32 4294967294, %s1666_s18   ;;  %s1666_s18 = sphi %s1703_s18, %s2224_s18   ;;  %s1662_s17 = sphi %s1701_s17, %s2223_s17   ;;  %s1658_s16 = sphi %s1699_s16, %s2222_s16   ;;  %s1654_s15 = sphi %s1697_s15, %s2221_s15  }
   0x4   : > { %s1722_s21 = sadd.s32 1, %s1666_s18   ;;  %s113_s22 = sadd.s32 1, %s1662_s17 }
   0x5   : > { %s110_s23 = ssub.s32 %s1666_s18, %s1722_s21  ;;  %p123_p0 = scmp.ne.s32.totalorder %s1662_s17, %s1658_s16 }
   0x6   : > { %p111_p1 = scmp.eq.s32.totalorder %s110_s23, 0  ;;  %p124_p2 = scmp.eq.s32.totalorder %s1718_s19, 1 }
   0x7   : > { %p129_p3 = scmp.ne.s32.totalorder %s1658_s16, %s1654_s15  ;;  %p130_p4 = scmp.eq.s32.totalorder %s1164_s20, 1 }
   0x8   : > { %s1733_s24 = scalar_select %p111_p1, %s1662_s17, %s113_s22  }
   0x9   : > { %p1735_p5 = por %p124_p2, %p123_p0  ;;  %p1739_p6 = por %p130_p4, %p129_p3 }
   0xa   : > { %p1167_p7 = scmp.ge.s32.totalorder %s1666_s18, 1  ;;  %p167_p8 = scmp.lt.s32.totalorder %s1666_s18, 3 }
   0xc   : > { %p168_p9 = pnand %p1167_p7, %p167_p8 }
   0xd   : > { %v230_v0 = vld [vmem:[%s2214_s1 + $0x80] sm:$0xff] (!%p168_p9)  ;;  %v231_v1 = vld [vmem:[%s2214_s1 + $0x88] sm:$0xff] (!%p168_p9)  ;;  %s1168_s7 = sshll.u32 (!%p168_p9), %s1718_s19, 2  ;;  %v232_v9 = vld [vmem:[%s2214_s1 + $0x90] sm:$0xff] (!%p168_p9)  ;;  %vm641_vm0 = vcmask (!%p168_p9), 64512   ;;  %s191_s12 = sand.u32 (!%p168_p9), 1, %s1658_s16  }
   0xe   : > { %171 = sbr.rel (%p168_p9) target bundleno = 570 (0x23a), region = 36  ;;  %v214_v2 = vld [vmem:[%s2214_s1] sm:$0xff] (!%p168_p9)  ;;  %v1755_v3 = vpack.c.bf16 (!%p168_p9), %v231_v1, %v230_v0  ;;  %v215_v4 = vld [vmem:[%s2214_s1 + $0x8] sm:$0xff] (!%p168_p9)  ;;  %p1766_p10 = scmp.lt.s32.totalorder (!%p168_p9), %s1168_s7, 7  ;;  %v233_v10 = vld [vmem:[%s2214_s1 + $0x98] sm:$0xff] (!%p168_p9) }
   0xf   : > { %v246_v5 = vld [vmem:[%s2214_s1 + $0x100] sm:$0xff] (!%p168_p9)  ;;  %v247_v6 = vld [vmem:[%s2214_s1 + $0x108] sm:$0xff] (!%p168_p9)  ;;  %v1770_v7 = vpack.c.bf16 (!%p168_p9), %v215_v4, %v214_v2  ;;  %v216_v11 = vld [vmem:[%s2214_s1 + $0x10] sm:$0xff] (!%p168_p9)  ;;  %v1784_v12 = vpack.c.bf16 (!%p168_p9), %v233_v10, %v232_v9  ;;  %s1551_s14 = smul.u32 (!%p168_p9), 96, %s191_s12  ;;  %s2172_s5 = scalar_lea.sflag (!%p168_p9), [#allocation3], %s191_s12 }
  0x10   : > { %v1772_v8 = vpack.c.bf16 (!%p168_p9), %v247_v6, %v246_v5  ;;  %1422 = vmatprep.subr.bf16.mxu0 (!%p168_p9), %v1755_v3  ;;  %v217_v13 = vld [vmem:[%s2214_s1 + $0x18] sm:$0xff] (!%p168_p9)  ;;  %v248_v14 = vld [vmem:[%s2214_s1 + $0x110] sm:$0xff] (!%p168_p9)  ;;  %v234_v18 = vld [vmem:[%s2214_s1 + $0xa0] sm:$0xff] (!%p168_p9)  ;;  %s1553_s22 = smul.u32 (!%p168_p9), 1536, %s1718_s19 }
  0x11   : > { %v249_v15 = vld [vmem:[%s2214_s1 + $0x118] sm:$0xff] (!%p168_p9)  ;;  %1424 = vmatpush3.bf16.msra.mxu0 (!%p168_p9), %v1770_v7  ;;  %v1797_v16 = vpack.c.bf16 (!%p168_p9), %v217_v13, %v216_v11  ;;  %v235_v19 = vld [vmem:[%s2214_s1 + $0xa8] sm:$0xff] (!%p168_p9)  ;;  %v218_v20 = vld [vmem:[%s2214_s1 + $0x20] sm:$0xff] (!%p168_p9)  ;;  %s2139_s20 = scalar_lea.vmem (!%p168_p9), [#allocation2], %s1551_s14 }
  0x12   : > { %1454 = vmatprep.subr.bf16.mxu1 (!%p168_p9), %v1772_v8  ;;  %v1799_v17 = vpack.c.bf16 (!%p168_p9), %v249_v15, %v248_v14  ;;  %1426 = vmatprep.subr.bf16.mxu0 (!%p168_p9), %v1784_v12  ;;  %v1812_v21 = vpack.c.bf16 (!%p168_p9), %v235_v19, %v234_v18  ;;  %v219_v22 = vld [vmem:[%s2214_s1 + $0x28] sm:$0xff] (!%p168_p9)  ;;  %v250_v23 = vld [vmem:[%s2214_s1 + $0x120] sm:$0xff] (!%p168_p9)  ;;  %v236_v26 = vld [vmem:[%s2214_s1 + $0xb0] sm:$0xff] (!%p168_p9)  ;;  %s1102_s23 = sshll.u32 (!%p168_p9), %s2139_s20, 4  ;;  %s2164_s30 = scalar_lea.hbm (!%p168_p9), %s2217_s4, %s1553_s22  ;;  %s2166_s23 = int_to_ptr.vmem [resolvable:$true] %s1102_s23 }
  0x13   : > { %1456 = vmatpush3.bf16.msra.mxu1 (!%p168_p9), %v1772_v8  ;;  %v251_v24 = vld [vmem:[%s2214_s1 + $0x128] sm:$0xff] (!%p168_p9)  ;;  %v237_v27 = vld [vmem:[%s2214_s1 + $0xb8] sm:$0xff] (!%p168_p9)  ;;  %v252_v28 = vld [vmem:[%s2214_s1 + $0x130] sm:$0xff] (!%p168_p9)  ;;  %v1843_v30 = vpack.c.bf16 (!%p168_p9), %v219_v22, %v218_v20  ;;  %s1604_s6 = scalar_lea.vmem (!%p168_p9), %s2166_s23, 1536 }
  0x14   : > { %1458 = vmatprep.subr.bf16.mxu1 (!%p168_p9), %v1799_v17  ;;  %v1828_v25 = vpack.c.bf16 (!%p168_p9), %v251_v24, %v250_v23  ;;  %v253_v29 = vld [vmem:[%s2214_s1 + $0x138] sm:$0xff] (!%p168_p9)  ;;  %v1847_v31 = vpack.c.bf16 (!%p168_p9), %v237_v27, %v236_v26  ;;  %v220_v32 = vld [vmem:[%s2214_s1 + $0x30] sm:$0xff] (!%p168_p9)  ;;  %v238_v35 = vld [vmem:[%s2214_s1 + $0xc0] sm:$0xff] (!%p168_p9)  ;;  %p1605_p11 = scmp.ne.s32.totalorder (!%p168_p9), %s2166_s23, %s1604_s6 }
  0x15   : > { %s2226_s7 = smov (!%p1766_p10, %s1168_s7), 7  ;;  %1428 = vmatpush3.bf16.msra.mxu0 %v1797_v16  ;;  %v221_v33 = vld [vmem:[%s2214_s1 + $0x38] sm:$0xff]  ;;  %v1857_v34 = vpack.c.bf16 %v253_v29, %v252_v28  ;;  %v239_v36 = vld [vmem:[%s2214_s1 + $0xc8] sm:$0xff]  ;;  %v254_v37 = vld [vmem:[%s2214_s1 + $0x140] sm:$0xff] }
  0x16   : > { %1430 = vmatprep.subr.bf16.mxu0 %v1812_v21  ;;  %s1552_s29 = smul.u32 24, %s2226_s7  ;;  %v255_v38 = vld [vmem:[%s2214_s1 + $0x148] sm:$0xff]  ;;  %v1872_v39 = vpack.c.bf16 %v221_v33, %v220_v32  ;;  %v1876_v40 = vpack.c.bf16 %v239_v36, %v238_v35  ;;  %v222_v41 = vld [vmem:[%s2214_s1 + $0x40] sm:$0xff]  ;;  %v240_v44 = vld [vmem:[%s2214_s1 + $0xd0] sm:$0xff]  ;;  %p1606_p12 = pnand %p1605_p11, %p1735_p5 }
  0x17   : > { %1460 = vmatpush3.bf16.msra.mxu1 %v1799_v17  ;;  %v223_v42 = vld [vmem:[%s2214_s1 + $0x48] sm:$0xff]  ;;  %v1890_v43 = vpack.c.bf16 %v255_v38, %v254_v37  ;;  %v241_v45 = vld [vmem:[%s2214_s1 + $0xd8] sm:$0xff]  ;;  %v256_v46 = vld [vmem:[%s2214_s1 + $0x150] sm:$0xff] }
  0x18   : > { %1462 = vmatprep.subr.bf16.mxu1 %v1828_v25  ;;  %s1887_s27 = scalar_lea.vmem %s2213_s0, %s1552_s29  ;;  %v257_v47 = vld [vmem:[%s2214_s1 + $0x158] sm:$0xff]  ;;  %v1905_v48 = vpack.c.bf16 %v223_v42, %v222_v41  ;;  %v1915_v51 = vpack.c.bf16 %v241_v45, %v240_v44  ;;  %v224_v52 = vld [vmem:[%s2214_s1 + $0x50] sm:$0xff]  ;;  %v242_v55 = vld [vmem:[%s2214_s1 + $0xe0] sm:$0xff]  ;;  %p1607_p13 = pneg %p1606_p12 }
  0x19   : > { %1432 = vmatpush3.bf16.msra.mxu0 %v1843_v30  ;;  %v1908_v49 = vld [vmem:[%s1887_s27 + $0x8] sm:$0xff]  ;;  %v1911_v50 = vld [vmem:[%s1887_s27 + $0x10] sm:$0xff]  ;;  %v225_v53 = vld [vmem:[%s2214_s1 + $0x58] sm:$0xff]  ;;  %v1924_v54 = vpack.c.bf16 %v257_v47, %v256_v46 }
  0x1a   : > { %1434 = vmatprep.subr.bf16.mxu0 %v1847_v31  ;;  %v243_v56 = vld [vmem:[%s2214_s1 + $0xe8] sm:$0xff]  ;;  %326 = vmatprep.mubr.f32.mxu0 %v1908_v49  ;;  %v258_v57 = vld [vmem:[%s2214_s1 + $0x160] sm:$0xff]  ;;  %v1941_v59 = vpack.c.bf16 %v225_v53, %v224_v52  ;;  %v244_v0 = vld [vmem:[%s2214_s1 + $0xf0] sm:$0xff]  ;;  %v434_v22 = vmul.f32 %v1911_v50, %v1911_v50 }
  0x1b   : > { %1464 = vmatpush3.bf16.msra.mxu1 %v1828_v25  ;;  %v259_v58 = vld [vmem:[%s2214_s1 + $0x168] sm:$0xff]  ;;  %1361 = vmatprep.mubr.f32.mxu1 %v1911_v50  ;;  %v1945_v60 = vpack.c.bf16 %v243_v56, %v242_v55  ;;  %v226_v61 = vld [vmem:[%s2214_s1 + $0x60] sm:$0xff]  ;;  %v245_v1 = vld [vmem:[%s2214_s1 + $0xf8] sm:$0xff] }
  0x1c   : > { %1466 = vmatprep.subr.bf16.mxu1 %v1857_v34  ;;  %v227_v62 = vld [vmem:[%s2214_s1 + $0x68] sm:$0xff]  ;;  %v1954_v63 = vpack.c.bf16 %v259_v58, %v258_v57  ;;  %v260_v2 = vld [vmem:[%s2214_s1 + $0x170] sm:$0xff]  ;;  %v261_v4 = vld [vmem:[%s2214_s1 + $0x178] sm:$0xff]  ;;  %v1973_v6 = vpack.c.bf16 %v245_v1, %v244_v0 }
  0x1d   : > { %1436 = vmatpush3.bf16.msra.mxu0 %v1872_v39  ;;  %v1969_v5 = vpack.c.bf16 %v227_v62, %v226_v61  ;;  %v228_v9 = vld [vmem:[%s2214_s1 + $0x70] sm:$0xff]  ;;  %v229_v10 = vld [vmem:[%s2214_s1 + $0x78] sm:$0xff]  ;;  %v1982_v11 = vpack.c.bf16 %v261_v4, %v260_v2  ;;  %v1989_v14 = vld [vmem:[%s1887_s27] sm:$0xff] }
  0x1e   : > { %1438 = vmatprep.subr.bf16.mxu0 %v1876_v40  ;;  %v1451_v13 = vpack.c.bf16 %v229_v10, %v228_v9  ;;  %v1994_v15 = vld [vmem:[%s1887_s27 + $0x28] sm:$0xff]  ;;  %v1998_v18 = vld [vmem:[%s1887_s27 + $0x20] sm:$0xff]  ;;  %v2004_v19 = vld [vmem:[%s1887_s27 + $0x18] sm:$0xff] }
  0x1f   : > { %1468 = vmatpush3.bf16.msra.mxu1 %v1857_v34  ;;  %v2007_v20 = vld [vmem:[%s1887_s27 + $0x40] sm:$0xff]  ;;  %v437_v23 = vmul.f32 %v1994_v15, %v1994_v15  ;;  %v436_v24 = vmul.f32 %v1998_v18, %v1998_v18  ;;  %v435_v26 = vmul.f32 %v2004_v19, %v2004_v19  ;;  %v639_v32 = vld [vmem:[%s2215_s2 + $0x8] sm:$0xff]  ;;  %v2097_v35 = vld [vmem:[%s2215_s2 + $0x10] sm:$0xff] }
  0x20   : > { %1470 = vmatprep.subr.bf16.mxu1 %v1890_v43  ;;  %v2090_v33 = vld [vmem:[%s2215_s2] sm:$0xff] }
  0x21   : > { %1440 = vmatpush3.bf16.msra.mxu0 %v1905_v48 }
  0x22   : > { %1442 = vmatprep.subr.bf16.mxu0 %v1915_v51 }
  0x23   : > { %1472 = vmatpush3.bf16.msra.mxu1 %v1890_v43 }
  0x24   : > { %1474 = vmatprep.subr.bf16.mxu1 %v1924_v54 }
  0x25   : > { %1444 = vmatpush3.bf16.msra.mxu0 %v1941_v59 }
  0x26   : > { %1446 = vmatprep.subr.bf16.mxu0 %v1945_v60 }
  0x27   : > { %1476 = vmatpush3.bf16.msra.mxu1 %v1924_v54 }
  0x28   : > { %1478 = vmatprep.subr.bf16.mxu1 %v1954_v63 }
  0x29   : > { %1448 = vmatpush3.bf16.msra.mxu0 %v1969_v5 }
  0x2a   : > { %1450 = vmatprep.subr.bf16.mxu0 %v1973_v6 }
  0x2b   : > { %1480 = vmatpush3.bf16.msra.mxu1 %v1954_v63 }
  0x2c   : > { %1482 = vmatprep.subr.bf16.mxu1 %v1982_v11 }
  0x2d   : > { %1452 = vmatpush3.bf16.msra.mxu0 %v1451_v13 }
  0x2e   : > { %1486 = vmatprep.subr.bf16.mxu0 %v1755_v3  ;;  %v2012_v3 = vld [vmem:[%s1887_s27 + $0x38] sm:$0xff] }
  0x2f   : > { %1484 = vmatpush3.bf16.msra.mxu1 %v1982_v11  ;;  %v439_v27 = vmul.f32 %v2012_v3, %v2012_v3 }
  0x30   : > { %1518 = vmatprep.subr.bf16.mxu1 %v1772_v8  ;;  %327 = vmatmul.mubr.f32.vlgmr.msra.gmra.mrb[0].mxu0 %v1989_v14 }
  0x31   : > { %1488 = vmatpush3.bf16.msra.mxu0 %v1770_v7  ;;  %331 = vmatprep.mubr.f32.mxu0 %v1998_v18  ;;  %v2019_v7 = vld [vmem:[%s1887_s27 + $0x58] sm:$0xff] }
  0x32   : > { %1362 = vmatmul.mubr.f32.vlgmr.msra.gmra.mrb[0].mxu1 %v1994_v15  ;;  %1490 = vmatprep.subr.bf16.mxu0 %v1784_v12  ;;  %v2031_v12 = vld [vmem:[%s1887_s27 + $0x50] sm:$0xff]  ;;  %v443_v28 = vmul.f32 %v2019_v7, %v2019_v7 }
  0x33   : > { %1520 = vmatpush3.bf16.msra.mxu1 %v1772_v8  ;;  %1364 = vmatprep.mubr.f32.mxu1 %v2007_v20  ;;  %v2026_v8 = vld [vmem:[%s1887_s27 + $0x30] sm:$0xff] }
  0x34   : > { %1522 = vmatprep.subr.bf16.mxu1 %v1799_v17  ;;  %332 = vmatmul.mubr.f32.gmra.mrb[2].mxu0 %v2004_v19  ;;  %v438_v29 = vmul.f32 %v2026_v8, %v2026_v8 }
  0x35   : > { %1492 = vmatpush3.bf16.msra.mxu0 %v1797_v16  ;;  %336 = vmatprep.mubr.f32.mxu0 %v2012_v3  ;;  %v2039_v16 = vld [vmem:[%s1887_s27 + $0x48] sm:$0xff]  ;;  %s1669_s27 = smov [#allocation2]  }
  0x36   : > { %1494 = vmatprep.subr.bf16.mxu0 %v1812_v21  ;;  %1365 = vmatmul.mubr.f32.gmra.mrb[2].mxu1 %v2019_v7  ;;  %v432_v21 = vmul.f32 %v1989_v14, %v1989_v14  ;;  %s1608_s8 = sshll.u32 %s1669_s27, 4  ;;  %s1609_s8 = int_to_ptr.vmem [resolvable:$false] %s1608_s8 }
  0x37   : > { %1524 = vmatpush3.bf16.msra.mxu1 %v1799_v17  ;;  %1399 = vmatprep.mubr.f32.mxu1 %v434_v22  ;;  %v433_v17 = vmul.f32 %v1908_v49, %v1908_v49  ;;  %s1610_s9 = scalar_lea.vmem %s1609_s8, 3072  ;;  %p1611_p0 = scmp.lt.s32.totalorder %s2166_s23, %s1609_s8 }
  0x38   : > { %1526 = vmatprep.subr.bf16.mxu1 %v1828_v25  ;;  %337 = vmatmul.mubr.f32.gmra.mrb[4].mxu0 %v2026_v8  ;;  %p1612_p1 = scmp.lt.s32.totalorder %s1610_s9, %s1604_s6 }
  0x39   : > { %1496 = vmatpush3.bf16.msra.mxu0 %v1843_v30  ;;  %341 = vmatprep.mubr.f32.mxu0 %v2031_v12  ;;  %v442_v30 = vmul.f32 %v2031_v12, %v2031_v12 }
  0x3a   : > { %1498 = vmatprep.subr.bf16.mxu0 %v1847_v31  ;;  %v441_v31 = vmul.f32 %v2039_v16, %v2039_v16  ;;  %p1613_p2 = por %p1612_p1, %p1611_p0 }
  0x3b   : > { %1528 = vmatpush3.bf16.msra.mxu1 %v1828_v25  ;;  %v440_v25 = vmul.f32 %v2007_v20, %v2007_v20 }
  0x3c   : > { %1530 = vmatprep.subr.bf16.mxu1 %v1857_v34  ;;  %342 = vmatmul.mubr.f32.gmra.mrb[6].mxu0 %v2039_v16  ;;  %p1614_p3 = pnand %p1613_p2, %p1607_p13 }
  0x3d   : > { %1500 = vmatpush3.bf16.msra.mxu0 %v1872_v39  ;;  %508 = vmatprep.mubr.f32.mxu0 %v433_v17 }
  0x3e   : > { %1502 = vmatprep.subr.bf16.mxu0 %v1876_v40 }
  0x3f   : > { %1532 = vmatpush3.bf16.msra.mxu1 %v1857_v34  ;;  %v1668_v34 = vmov 0.0  }
  0x40   : > { %1534 = vmatprep.subr.bf16.mxu1 %v1890_v43 }
  0x41   : > { %1504 = vmatpush3.bf16.msra.mxu0 %v1905_v48 }
  0x42   : > { %1506 = vmatprep.subr.bf16.mxu0 %v1915_v51 }
  0x43   : > { %1536 = vmatpush3.bf16.msra.mxu1 %v1890_v43 }
  0x44   : > { %1538 = vmatprep.subr.bf16.mxu1 %v1924_v54 }
  0x45   : > { %1508 = vmatpush3.bf16.msra.mxu0 %v1941_v59 }
  0x46   : > { %1510 = vmatprep.subr.bf16.mxu0 %v1945_v60 }
  0x47   : > { %1540 = vmatpush3.bf16.msra.mxu1 %v1924_v54 }
  0x48   : > { %1542 = vmatprep.subr.bf16.mxu1 %v1954_v63 }
  0x49   : > { %1512 = vmatpush3.bf16.msra.mxu0 %v1969_v5 }
  0x4a   : > { %1514 = vmatprep.subr.bf16.mxu0 %v1973_v6 }
  0x4b   : > { %1544 = vmatpush3.bf16.msra.mxu1 %v1954_v63 }
  0x4c   : > { %1546 = vmatprep.subr.bf16.mxu1 %v1982_v11 }
  0x4d   : > { %1516 = vmatpush3.bf16.msra.mxu0 %v1451_v13 }
  0x4e   : > { %1405 = vmatprep.subr.mxu0 %v2097_v35 }
  0x4f   : > { %1548 = vmatpush3.bf16.msra.mxu1 %v1982_v11 }
  0x50   : > { %509 = vmatmul.mubr.f32.vlgmr.msra.gmra.mrb[8].mxu0 %v432_v21  ;;  %654 = vmatprep.subr.mxu1 %v639_v32 }
  0x51   : > { %513 = vmatprep.mubr.f32.mxu0 %v436_v24  ;;  %1406 = vmatpush3.msra.mxu0 %v2097_v35 }
  0x52   : > { %1400 = vmatmul.mubr.f32.vlgmr.msra.gmra.mrb[4].mxu1 %v437_v23  ;;  %848 = vmatprep.subr.mxu0 %v639_v32 }
  0x53   : > { %1402 = vmatprep.mubr.f32.mxu1 %v440_v25  ;;  %655 = vmatpush1.msra.mxu1 %v2090_v33 }
  0x54   : > { %514 = vmatmul.mubr.f32.gmra.mrb[10].mxu0 %v435_v26  ;;  %1549 = vmatprep.subr.mxu1 %v2097_v35 }
  0x55   : > { %518 = vmatprep.mubr.f32.mxu0 %v439_v27 }
  0x56   : > { %1403 = vmatmul.mubr.f32.gmra.mrb[6].mxu1 %v443_v28 }
  0x57   : > { %718 = vmatprep.mubr.f32.mxu1 %v1668_v34 }
  0x58   : > { %519 = vmatmul.mubr.f32.gmra.mrb[12].mxu0 %v438_v29 }
  0x59   : > { %523 = vmatprep.mubr.f32.mxu0 %v442_v30 }
  0x5c   : > { %524 = vmatmul.mubr.f32.gmra.mrb[14].mxu0 %v441_v31 }
 0x103   : > { %v1223_v36 = vpop.f32.mrb[0].mxu0 }
 0x104   : > { %v1224_v37 = vpop.f32.mrb[1].mxu0 }
 0x105   : > { %v1363_v38 = vpop.f32.mrb[0].mxu1  ;;  %v1225_v39 = vadd.f32 %v1224_v37, %v1223_v36 }
 0x106   : > { %v413_v40 = vpop.f32.mrb[1].mxu1 }
 0x107   : > { %v414_v41 = vadd.f32 %v1225_v39, %v413_v40  ;;  %v1226_v42 = vpop.f32.mrb[2].mxu0 }
 0x108   : > { %v1227_v43 = vpop.f32.mrb[3].mxu0 }
 0x109   : > { %v1228_v44 = vadd.f32 %v1227_v43, %v1226_v42  ;;  %v1366_v45 = vpop.f32.mrb[2].mxu1  ;;  %v614_v61 = vmul.f32 0.020833334, %v414_v41 }
 0x10a   : > { %v423_v48 = vpop.f32.mrb[3].mxu1 }
 0x10b   : > { %v419_v46 = vadd.f32 %v1363_v38, %v1228_v44  ;;  %v1229_v47 = vpop.f32.mrb[4].mxu0  ;;  %v622_v5 = vmul.f32 %v614_v61, %v614_v61 }
 0x10c   : > { %v1230_v51 = vpop.f32.mrb[5].mxu0 }
 0x10d   : > { %v1231_v52 = vadd.f32 %v1230_v51, %v1229_v47  ;;  %v615_v6 = vmul.f32 0.020833334, %v419_v46  ;;  %v828_v46 = vsub.f32 0.0, %v614_v61 }
 0x10f   : > { %v424_v53 = vadd.f32 %v1231_v52, %v423_v48  ;;  %v1232_v54 = vpop.f32.mrb[6].mxu0  ;;  %v623_v24 = vmul.f32 %v615_v6, %v615_v6  ;;  %v829_v52 = vsub.f32 0.0, %v615_v6 }
 0x110   : > { %v1233_v55 = vpop.f32.mrb[7].mxu0 }
 0x111   : > { %v1234_v56 = vadd.f32 %v1233_v55, %v1232_v54  ;;  %v616_v21 = vmul.f32 0.020833334, %v424_v53 }
 0x113   : > { %v429_v57 = vadd.f32 %v1366_v45, %v1234_v56  ;;  %v624_v31 = vmul.f32 %v616_v21, %v616_v21  ;;  %v830_v55 = vsub.f32 0.0, %v616_v21 }
 0x115   : > { %v617_v36 = vmul.f32 0.020833334, %v429_v57 }
 0x117   : > { %v625_v42 = vmul.f32 %v617_v36, %v617_v36 }
 0x123   : > { %v1287_v58 = vpop.f32.mrb[8].mxu0 }
 0x124   : > { %v1288_v59 = vpop.f32.mrb[9].mxu0 }
 0x125   : > { %v1401_v60 = vpop.f32.mrb[4].mxu1  ;;  %v1289_v62 = vadd.f32 %v1288_v59, %v1287_v58  ;;  %v831_v58 = vsub.f32 0.0, %v617_v36 }
 0x126   : > { %v595_v63 = vpop.f32.mrb[5].mxu1 }
 0x127   : > { %v596_v0 = vadd.f32 %v1289_v62, %v595_v63  ;;  %v1290_v1 = vpop.f32.mrb[10].mxu0 }
 0x128   : > { %v1291_v2 = vpop.f32.mrb[11].mxu0 }
 0x129   : > { %v1404_v4 = vpop.f32.mrb[6].mxu1  ;;  %v618_v9 = vmul.f32 0.020833334, %v596_v0  ;;  %v1292_v10 = vadd.f32 %v1291_v2, %v1290_v1 }
 0x12a   : > { %v605_v11 = vpop.f32.mrb[7].mxu1 }
 0x12b   : > { %v626_v13 = vsub.f32 %v618_v9, %v622_v5  ;;  %v601_v22 = vadd.f32 %v1401_v60, %v1292_v10  ;;  %v1293_v17 = vpop.f32.mrb[12].mxu0  ;;  %v1048_v60 = vlaneseq }
 0x12c   : > { %v1294_v23 = vpop.f32.mrb[13].mxu0 }
 0x12d   : > { %v630_v25 = vadd.f32 1e-05, %v626_v13  ;;  %v619_v26 = vmul.f32 0.020833334, %v601_v22  ;;  %v1295_v27 = vadd.f32 %v1294_v23, %v1293_v17  ;;  %v1049_v61 = vshrl.u32 %v1048_v60, 7 }
 0x12f   : > { %1596 = vrsqrt.f32 %v630_v25  ;;  %v627_v28 = vsub.f32 %v619_v26, %v623_v24  ;;  %v606_v29 = vadd.f32 %v1295_v27, %v605_v11  ;;  %v1296_v30 = vpop.f32.mrb[14].mxu0  ;;  %v1050_v0 = vsub.s32 0, %v1049_v61 }
 0x130   : > { %v1297_v32 = vpop.f32.mrb[15].mxu0  ;;  %v1054_v2 = vsub.s32 1, %v1049_v61 }
 0x131   : > { %v631_v37 = vadd.f32 1e-05, %v627_v28  ;;  %v620_v38 = vmul.f32 0.020833334, %v606_v29  ;;  %v1298_v39 = vadd.f32 %v1297_v32, %v1296_v30 }
 0x133   : > { %1598 = vrsqrt.f32 %v631_v37  ;;  %v628_v40 = vsub.f32 %v620_v38, %v624_v31  ;;  %v611_v41 = vadd.f32 %v1404_v4, %v1298_v39  ;;  %v1058_v37 = vsub.s32 2, %v1049_v61 }
 0x135   : > { %v632_v43 = vadd.f32 1e-05, %v628_v40  ;;  %v621_v44 = vmul.f32 0.020833334, %v611_v41 }
 0x137   : > { %1600 = vrsqrt.f32 %v632_v43  ;;  %v629_v45 = vsub.f32 %v621_v44, %v625_v42 }
 0x139   : > { %v1597_v47 = vpop.eup %1596  ;;  %v633_v48 = vadd.f32 1e-05, %v629_v45 }
 0x13a   : > { %1170 = vmatmul.mubr.msk.f32.vlgmr.msra.gmra.mrb[8].mxu1 %vm641_vm0, %v1597_v47  ;;  %1407 = vmatprep.mubr.msk.f32.mxu0 %vm641_vm0, %v1597_v47  ;;  %v832_v51 = vmul.f32 %v1597_v47, %v828_v46 }
 0x13b   : > { %1602 = vrsqrt.f32 %v633_v48  ;;  %1550 = vmatpush3.msra.mxu1 %v2097_v35  ;;  %724 = vmatprep.mubr.f32.mxu1 %v1668_v34 }
 0x13c   : > { %1413 = vmatprep.subr.mxu1 %v2097_v35 }
 0x13d   : > { %v1599_v53 = vpop.eup %1598 }
 0x13e   : > { %1171 = vmatmul.mubr.msk.f32.gmra.mrb[10].mxu1 %vm641_vm0, %v1599_v53  ;;  %1408 = vmatmul.mubr.msk.f32.vlgmr.msra.gmra.mrb[16].mxu0 %vm641_vm0, %v1599_v53  ;;  %v833_v54 = vmul.f32 %v1599_v53, %v829_v52 }
 0x13f   : > { %730 = vmatprep.mubr.f32.mxu1 %v1668_v34  ;;  %849 = vmatpush1.msra.mxu0 %v2090_v33 }
 0x140   : > { %912 = vmatprep.mubr.f32.mxu0 %v1668_v34 }
 0x141   : > { %v1601_v56 = vpop.eup %1600 }
 0x142   : > { %1172 = vmatmul.mubr.msk.f32.gmra.mrb[12].mxu1 %vm641_vm0, %v1601_v56  ;;  %1178 = vmatmul.mubr.msk.f32.vlgmr.msra.gmra.mrb[18].mxu0 %vm641_vm0, %v832_v51  ;;  %v834_v57 = vmul.f32 %v1601_v56, %v830_v55 }
 0x143   : > { %736 = vmatprep.mubr.f32.mxu1 %v1668_v34  ;;  %918 = vmatprep.mubr.f32.mxu0 %v1668_v34 }
 0x145   : > { %v1603_v59 = vpop.eup %1602 }
 0x146   : > { %1173 = vmatmul.mubr.msk.f32.gmra.mrb[14].mxu1 %vm641_vm0, %v1603_v59  ;;  %1179 = vmatmul.mubr.msk.f32.gmra.mrb[20].mxu0 %vm641_vm0, %v833_v54  ;;  %v835_v33 = vmul.f32 %v1603_v59, %v831_v58 }
 0x147   : > { %1410 = vmatprep.mubr.msk.f32.mxu1 %vm641_vm0, %v1601_v56  ;;  %924 = vmatprep.mubr.f32.mxu0 %v1668_v34 }
 0x14a   : > { %1411 = vmatmul.mubr.msk.f32.vlgmr.msra.gmra.mrb[16].mxu1 %vm641_vm0, %v1603_v59  ;;  %1180 = vmatmul.mubr.msk.f32.gmra.mrb[22].mxu0 %vm641_vm0, %v834_v57 }
 0x14b   : > { %1414 = vmatpush3.msra.mxu1 %v2097_v35  ;;  %1415 = vmatprep.mubr.msk.f32.mxu1 %vm641_vm0, %v832_v51 }
 0x14c   : > { %930 = vmatprep.mubr.f32.mxu0 %v1668_v34  ;;  %v1046_v34 = vld [vmem:[%s2216_s3] sm:$0x7] }
 0x14d   : > { %v1051_v9 = vrot.slane %v1046_v34, %v1050_v0  ;;  %v1055_v22 = vrot.slane %v1046_v34, %v1054_v2  ;;  %v1059_v47 = vrot.slane %v1046_v34, %v1058_v37 }
 0x14e   : > { %1181 = vmatmul.mubr.msk.f32.gmra.mrb[24].mxu0 %vm641_vm0, %v835_v33  ;;  %1416 = vmatmul.mubr.msk.f32.vlgmr.msra.gmra.mrb[18].mxu1 %vm641_vm0, %v833_v54 }
 0x14f   : > { %1418 = vmatprep.mubr.msk.f32.mxu1 %vm641_vm0, %v834_v57 }
 0x152   : > { %1419 = vmatmul.mubr.msk.f32.gmra.mrb[20].mxu1 %vm641_vm0, %v835_v33 }
 0x20d   : > { %v720_v62 = vpop.f32.mrb[8].mxu1 }
 0x20e   : > { %v722_v63 = vpop.f32.mrb[9].mxu1  ;;  %v1022_v6 = vmul.f32 %v720_v62, %v1989_v14 }
 0x20f   : > { %v1023_v10 = vmul.f32 %v722_v63, %v1908_v49 }
 0x211   : > { %v726_v35 = vpop.f32.mrb[10].mxu1  ;;  %v1409_v1 = vpop.f32.mrb[16].mxu0 }
 0x212   : > { %v728_v4 = vpop.f32.mrb[11].mxu1  ;;  %v809_v5 = vpop.f32.mrb[17].mxu0  ;;  %v1025_v25 = vmul.f32 %v726_v35, %v2004_v19  ;;  %v1027_v45 = vmul.f32 %v1409_v1, %v1994_v15 }
 0x213   : > { %v1026_v27 = vmul.f32 %v728_v4, %v1998_v18  ;;  %v1024_v48 = vmul.f32 %v809_v5, %v1911_v50 }
 0x215   : > { %v732_v11 = vpop.f32.mrb[12].mxu1  ;;  %v914_v13 = vpop.f32.mrb[18].mxu0 }
 0x216   : > { %v1034_v17 = vadd.f32 %v1022_v6, %v914_v13  ;;  %v734_v21 = vpop.f32.mrb[13].mxu1  ;;  %v916_v23 = vpop.f32.mrb[19].mxu0  ;;  %v1028_v19 = vmul.f32 %v732_v11, %v2026_v8 }
 0x217   : > { %v1035_v24 = vadd.f32 %v1023_v10, %v916_v23  ;;  %v1029_v18 = vmul.f32 %v734_v21, %v2012_v3 }
 0x218   : > { %v1063_v26 = vadd.f32 %v1051_v9, %v1034_v17 }
 0x219   : > { %v1064_v28 = vadd.f32 %v1055_v22, %v1035_v24  ;;  %v738_v29 = vpop.f32.mrb[14].mxu1  ;;  %v920_v30 = vpop.f32.mrb[20].mxu0 }
 0x21a   : > { %1075 = vst [vmem:[%s2139_s20] sm:$0xff] %v1063_v26  ;;  %v1037_v49 = vadd.f32 %v1025_v25, %v920_v30  ;;  %v740_v14 = vpop.f32.mrb[15].mxu1  ;;  %v922_v31 = vpop.f32.mrb[21].mxu0  ;;  %v1031_v46 = vmul.f32 %v738_v29, %v2039_v16 }
 0x21b   : > { %1076 = vst [vmem:[%s2139_s20 + $0x8] sm:$0xff] %v1064_v28  ;;  %v1038_v32 = vadd.f32 %v1026_v27, %v922_v31  ;;  %v1032_v3 = vmul.f32 %v740_v14, %v2031_v12 }
 0x21c   : > { %v1066_v36 = vadd.f32 %v1051_v9, %v1037_v49 }
 0x21d   : > { %v1067_v38 = vadd.f32 %v1055_v22, %v1038_v32  ;;  %v1412_v39 = vpop.f32.mrb[16].mxu1  ;;  %v926_v40 = vpop.f32.mrb[22].mxu0 }
 0x21e   : > { %1078 = vst [vmem:[%s2139_s20 + $0x18] sm:$0xff] %v1066_v36  ;;  %v1040_v41 = vadd.f32 %v1028_v19, %v926_v40  ;;  %v819_v42 = vpop.f32.mrb[17].mxu1  ;;  %v928_v43 = vpop.f32.mrb[23].mxu0  ;;  %v1033_v50 = vmul.f32 %v1412_v39, %v2019_v7 }
 0x21f   : > { %1079 = vst [vmem:[%s2139_s20 + $0x20] sm:$0xff] %v1067_v38  ;;  %v1041_v44 = vadd.f32 %v1029_v18, %v928_v43  ;;  %v1030_v59 = vmul.f32 %v819_v42, %v2007_v20 }
 0x220   : > { %v1069_v8 = vadd.f32 %v1051_v9, %v1040_v41 }
 0x221   : > { %v1070_v51 = vadd.f32 %v1055_v22, %v1041_v44  ;;  %v932_v52 = vpop.f32.mrb[24].mxu0  ;;  %v1417_v53 = vpop.f32.mrb[18].mxu1 }
 0x222   : > { %1081 = vst [vmem:[%s2139_s20 + $0x30] sm:$0xff] %v1069_v8  ;;  %v1043_v54 = vadd.f32 %v1031_v46, %v932_v52  ;;  %v1039_v55 = vadd.f32 %v1417_v53, %v1027_v45  ;;  %v934_v56 = vpop.f32.mrb[25].mxu0  ;;  %v1003_v15 = vpop.f32.mrb[19].mxu1 }
 0x223   : > { %1082 = vst [vmem:[%s2139_s20 + $0x38] sm:$0xff] %v1070_v51  ;;  %v1044_v16 = vadd.f32 %v1032_v3, %v934_v56  ;;  %v1036_v57 = vadd.f32 %v1024_v48, %v1003_v15 }
 0x224   : > { %v1072_v58 = vadd.f32 %v1051_v9, %v1043_v54  ;;  %v1068_v12 = vadd.f32 %v1059_v47, %v1039_v55 }
 0x225   : > { %v1073_v33 = vadd.f32 %v1055_v22, %v1044_v16  ;;  %v1065_v60 = vadd.f32 %v1059_v47, %v1036_v57  ;;  %v1420_v61 = vpop.f32.mrb[20].mxu1 }
 0x226   : > { %1084 = vst [vmem:[%s2139_s20 + $0x48] sm:$0xff] %v1072_v58  ;;  %1080 = vst [vmem:[%s2139_s20 + $0x28] sm:$0xff] %v1068_v12  ;;  %v1045_v62 = vadd.f32 %v1420_v61, %v1033_v50  ;;  %v1013_v63 = vpop.f32.mrb[21].mxu1 }
 0x227   : > { %1085 = vst [vmem:[%s2139_s20 + $0x50] sm:$0xff] %v1073_v33  ;;  %1077 = vst [vmem:[%s2139_s20 + $0x10] sm:$0xff] %v1065_v60  ;;  %v1042_v7 = vadd.f32 %v1030_v59, %v1013_v63 }
 0x228   : > { %v1074_v0 = vadd.f32 %v1059_v47, %v1045_v62 }
 0x229   : > { %v1071_v20 = vadd.f32 %v1059_v47, %v1042_v7 }
 0x22a   : > { %1086 = vst [vmem:[%s2139_s20 + $0x58] sm:$0xff] %v1074_v0 }
 0x22b   : > { %1083 = vst [vmem:[%s2139_s20 + $0x40] sm:$0xff] %v1071_v20 }
 0x22c   : > { %1617 = shalt.err (!%p1614_p3)
}
 0x22d   : > { %s1618_s29 = scalar_lea.hbm %s2164_s30, 1536  ;;  %s1622_s12 = scalar_lea.hbm %s2217_s4, 3072 }
 0x22e   : > { %p1619_p4 = scmp.ne.s32.totalorder %s2164_s30, %s1618_s29  ;;  %p1623_p9 = scmp.lt.u32.totalorder %s2164_s30, %s2217_s4 }
 0x22f   : > { %p1624_p10 = scmp.lt.u32.totalorder %s1622_s12, %s1618_s29  ;;  %p1626_p12 = scmp.lt.u32.totalorder %s1618_s29, %s2164_s30 }
 0x230   : > { %p1620_p7 = pnand %p1619_p4, %p1735_p5 }
 0x231   : > { %p1625_p11 = por %p1624_p10, %p1623_p9 }
 0x232   : > { %p1621_p8 = pneg %p1620_p7 }
 0x233   : > { %p1627_p13 = por %p1626_p12, %p1625_p11 }
 0x235   : > { %p1628_p0 = pnand %p1627_p13, %p1621_p8 }
 0x237   : > { %1631 = shalt.err (!%p1628_p0)
}
 0x238   : > { %s1670_s14 = smov 384   ;;  %s1671_s20 = smov 24  }
 0x239   : > { %1554 = dma.vmem_to_hbm [thread:$0]  (%p1735_p5), %s2166_s23, 1536, %s2164_s30, %s2172_s5, %s1670_s14, %s1670_s14, %s1671_s20  }
 0x23a PF: > { %p1560_p1 = scmp.ge.s32.totalorder %s1666_s18, 2  ;;  %s1117_s22 = sand.u32 1, %s1654_s15  }
 0x23b   : > { %s1118_s28 = scalar_lea.sflag [#allocation3], %s1117_s22 }
 0x23c   : > { %p1557_p2 = pnand %p1560_p1, %p1739_p6 }
 0x23e   : > { %1649 = dma.done.wait (!%p1557_p2), %s1118_s28, 1536  }
 0x23f   : > { %1651 = vsyncadd (!%p1557_p2), %s1118_s28, 4294965760  ;;  %p14_p3 = scmp.ge.s32.totalorder %s1722_s21, 4   ;;  %s2221_s15 = smov %s1658_s16 }
 0x240   : > { %s2222_s16 = smov %s1662_s17  ;;  %s2223_s17 = smov %s1733_s24 }
 0x241   : > { %s2224_s18 = smov %s1722_s21  ;;  %16 = sbr.rel (!%p14_p3) target bundleno = 3 (0x3), region = 71 }
 0x248   :  { %1123 = vsyncpa [#allocation3], 1 }
 0x249   :  { %1125 = vsyncpa [#allocation3 + $0x1], 1 }

</bundles_post_ra>
